<compile_context>
chip_gen: v7x
topology: tpu7x:2x2x1
jax: 0.10.0
libtpu: 0.0.40
codegen_flags: <defaults>
</compile_context>

<pallas_src>
import jax
import jax.numpy as jnp
from jax.experimental import pallas as pl
from jax.experimental.pallas import tpu as pltpu

_LANE = 128
_PALLAS_MIN_BYTES = 4 * 1024 * 1024      # below this, XLA's fused reduction wins
_LATENT_MAX_ROWS = 4096                  # latent slab kept VMEM-resident up to this


# ---------------------------------------------------------------------------
# Small helpers
# ---------------------------------------------------------------------------
def _cdiv(a, b):
    return -(-a // b)


def _round_up(a, b):
    return _cdiv(a, b) * b


def _sublane_align(dtype):
    """Sublane multiple so sub-32-bit dtypes tile cleanly (f32->8, bf16->16, i8->32)."""
    itemsize = jnp.dtype(dtype).itemsize
    return max(8, (32 // (8 * itemsize)) * 8)


def _itemsize(x):
    return jnp.dtype(x.dtype).itemsize


def _vmem_capacity_bytes():
    try:
        cap = int(pltpu.get_tpu_info().vmem_capacity_bytes)
        if cap > 0:
            return cap
    except Exception:
        pass
    return 64 * 1024 * 1024              # conservative (v7x-sized) fallback


def _num_tensorcores():
    """2 only on megacore / dual-TensorCore chips a single pallas_call can span."""
    try:
        kind = str(jax.devices()[0].device_kind).lower()
    except Exception:
        return 1
    if any(t in kind for t in ("v4", "v5p", "v7", "7x")):
        return 2
    if "v5" in kind and "lite" not in kind and "v5e" not in kind:
        return 2                          # bare "TPU v5" == v5p
    return 1                              # v5e / v6e / unknown -> safe default


# ---------------------------------------------------------------------------
# Per-stream preparation: zero-copy slab + head/tail split
# ---------------------------------------------------------------------------
def _prepare_pair(a, b, target_buf_bytes):
    """Prepare one (lhs, rhs) squared-difference stream.

    Returns (a2d, b2d, block_rows, head_blocks, tail_sum) where a2d/b2d are
    (rows,128) lane-dense slabs (zero-copy reshape whenever size % 128 == 0),
    the kernel consumes `head_blocks` blocks of `block_rows` rows, and
    `tail_sum` (or None) is the plain-JAX reduction of the leftover rows.
    """
    f32 = jnp.float32
    n = a.size
    align = max(_sublane_align(a.dtype), _sublane_align(b.dtype))
    itemsize = max(_itemsize(a), _itemsize(b))
    target_rows = max(align, (target_buf_bytes // (_LANE * itemsize)) // align * align)

    rows = max(_cdiv(n, _LANE), 1)
    if n % _LANE == 0:
        a2d = a.reshape(rows, _LANE)                 # bitcast-compatible reshape
        b2d = b.reshape(rows, _LANE)
    else:
        # Rare ragged case: one small pad copy to reach lane alignment.
        pad = rows * _LANE - n
        a2d = jnp.pad(jnp.ravel(a), (0, pad)).reshape(rows, _LANE)
        b2d = jnp.pad(jnp.ravel(b), (0, pad)).reshape(rows, _LANE)

    block_rows = max(align, min(_round_up(rows, align), target_rows))
    head_blocks = rows // block_rows
    tail_sum = None
    if head_blocks == 0:
        # Smaller than one block: pad up to a single block (small copy).
        a2d = jnp.pad(a2d, ((0, block_rows - rows), (0, 0)))
        b2d = jnp.pad(b2d, ((0, block_rows - rows), (0, 0)))
        head_blocks = 1
    elif rows > head_blocks * block_rows:
        ta = a2d[head_blocks * block_rows:].astype(f32)
        tb = b2d[head_blocks * block_rows:].astype(f32)
        tail_sum = jnp.sum((ta - tb) ** 2)
    return a2d, b2d, block_rows, head_blocks, tail_sum


def _prepare_latent(mu, logvar):
    """Tiny mu/logvar slabs kept VMEM-resident; None if too big for the budget."""
    lat_align = max(_sublane_align(mu.dtype), _sublane_align(logvar.dtype))
    rows = _round_up(max(_cdiv(mu.size, _LANE), 1), lat_align)
    if rows > _LATENT_MAX_ROWS:
        return None                      # huge latent -> KL handled by plain XLA

    def slab(x):
        flat = jnp.ravel(x)
        pad = rows * _LANE - flat.shape[0]
        if pad:
            flat = jnp.pad(flat, (0, pad))
        return flat.reshape(rows, _LANE)

    return slab(mu), slab(logvar), rows


# ---------------------------------------------------------------------------
# Fused kernel
# ---------------------------------------------------------------------------
def _fold8(t):
    """(R,128) -> (8,128) by summing sublane-tile groups (pure vreg adds)."""
    r = t.shape[0]
    if r == 8:
        return t
    return jnp.sum(t.reshape(r // 8, 8, _LANE), axis=0)


def _make_kernel(has_noise, has_kl, nbpc, hb_x, hb_n):
    def kernel(*refs):
        idx = 0
        x_ref, y_ref = refs[idx], refs[idx + 1]; idx += 2
        if has_noise:
            pn_ref, an_ref = refs[idx], refs[idx + 1]; idx += 2
        if has_kl:
            mu_ref, lv_ref = refs[idx], refs[idx + 1]; idx += 2
        o_mse = refs[idx]; idx += 1
        if has_noise:
            o_diff = refs[idx]; idx += 1
        if has_kl:
            o_kl = refs[idx]; idx += 1

        p = pl.program_id(0)                 # core slot ("parallel")
        i = pl.program_id(1)                 # streaming step ("arbitrary")
        blk = p * nbpc + i                   # linear block index

        @pl.when(i == 0)
        def _init():
            o_mse[...] = jnp.zeros_like(o_mse)
            if has_noise:
                o_diff[...] = jnp.zeros_like(o_diff)

        # Hot path: element-wise VPU work folded straight into the resident
        # (8,128) output accumulators (no block-sized scratch RMW, no vst storm).
        @pl.when(blk < hb_x)
        def _acc_mse():
            d = x_ref[...].astype(jnp.float32) - y_ref[...].astype(jnp.float32)
            o_mse[...] += _fold8(d * d)

        if has_noise:
            @pl.when(blk < hb_n)
            def _acc_diff():
                dn = pn_ref[...].astype(jnp.float32) - an_ref[...].astype(jnp.float32)
                o_diff[...] += _fold8(dn * dn)

        if has_kl:
            @pl.when(i == nbpc - 1)
            def _kl():
                lv = jnp.clip(lv_ref[...].astype(jnp.float32), -10.0, 10.0)
                m = mu_ref[...].astype(jnp.float32)
                fold = _fold8(1.0 + lv - m * m - jnp.exp(lv))
                o_kl[...] = jnp.where(p == 0, fold, jnp.zeros_like(fold))

    return kernel


# ---------------------------------------------------------------------------
# Pallas wrapper: returns the three raw sums
# ---------------------------------------------------------------------------
def _pallas_loss_sums(inputs, targets, mu, logvar,
                      predicted_noise=None, actual_noise=None):
    has_noise = predicted_noise is not None and actual_noise is not None
    f32 = jnp.float32

    vmem_cap = _vmem_capacity_bytes()
    # ~4 MiB per stream buffer on 128 MiB-VMEM parts (v5e/v6e), ~2 MiB on 64 MiB
    # parts (v7x); x2 double buffering x up to 4 streams stays well inside limits.
    target_buf_bytes = (4 << 20) if vmem_cap >= (100 << 20) else (2 << 20)
    vmem_limit = int(min(vmem_cap * 3 // 4, 96 << 20))

    x2d, y2d, br_x, hb_x, tail_x = _prepare_pair(inputs, targets, target_buf_bytes)
    if has_noise:
        pn2d, an2d, br_n, hb_n, tail_n = _prepare_pair(
            predicted_noise, actual_noise, target_buf_bytes)
    else:
        br_n, hb_n, tail_n = 0, 0, None

    lat = _prepare_latent(mu, logvar)
    has_kl = lat is not None

    nblocks = max(hb_x, hb_n)
    ncores = 2 if (_num_tensorcores() >= 2 and nblocks >= 2) else 1
    nbpc = _cdiv(nblocks, ncores)

    def _stream_map(hb):
        # Clamp so padded / guarded grid slots keep the DMA in bounds (the
        # revisited block is elided by the pipeline; its contribution is
        # skipped by the in-kernel guard).
        return lambda p, i: (jnp.minimum(p * nbpc + i, hb - 1), 0)

    operands = [x2d, y2d]
    in_specs = [pl.BlockSpec((br_x, _LANE), _stream_map(hb_x))] * 2
    if has_noise:
        operands += [pn2d, an2d]
        in_specs += [pl.BlockSpec((br_n, _LANE), _stream_map(hb_n))] * 2
    if has_kl:
        mu2d, lv2d, lat_rows = lat
        operands += [mu2d, lv2d]
        in_specs += [pl.BlockSpec((lat_rows, _LANE), lambda p, i: (0, 0))] * 2

    n_out = 1 + int(has_noise) + int(has_kl)
    out_shape = tuple(jax.ShapeDtypeStruct((ncores * 8, _LANE), f32)
                      for _ in range(n_out))
    out_specs = [pl.BlockSpec((8, _LANE), lambda p, i: (p, 0)) for _ in range(n_out)]

    outs = pl.pallas_call(
        _make_kernel(has_noise, has_kl, nbpc, hb_x, hb_n),
        out_shape=out_shape,
        grid_spec=pltpu.PrefetchScalarGridSpec(
            num_scalar_prefetch=0,
            grid=(ncores, nbpc),
            in_specs=in_specs,
            out_specs=out_specs,
        ),
        compiler_params=pltpu.CompilerParams(
            dimension_semantics=("parallel", "arbitrary"),
            vmem_limit_bytes=vmem_limit,
        ),
    )(*operands)
    outs = list(outs) if isinstance(outs, (tuple, list)) else [outs]

    idx = 0
    mse_sum = jnp.sum(outs[idx]); idx += 1
    diff_sum = None
    if has_noise:
        diff_sum = jnp.sum(outs[idx]); idx += 1
    if has_kl:
        kl_sum = jnp.sum(outs[idx]); idx += 1
    else:
        lv = jnp.clip(logvar.astype(f32), -10.0, 10.0)
        kl_sum = jnp.sum(1.0 + lv - mu.astype(f32) ** 2 - jnp.exp(lv))

    if tail_x is not None:
        mse_sum = mse_sum + tail_x
    if has_noise and tail_n is not None:
        diff_sum = diff_sum + tail_n
    return mse_sum, kl_sum, diff_sum


# ---------------------------------------------------------------------------
# Public API (matches CustomLoss.forward) + pure-JAX fallback/reference
# ---------------------------------------------------------------------------
def _jax_loss(inputs, targets, mu, logvar, lmbd, lmbd2,
              actual_noise=None, predicted_noise=None):
    f32 = jnp.float32
    mse = jnp.mean((inputs.astype(f32) - targets.astype(f32)) ** 2)
    lv = jnp.clip(logvar.astype(f32), -10.0, 10.0)
    kl = -0.5 * jnp.mean(1.0 + lv - mu.astype(f32) ** 2 - jnp.exp(lv))
    diff = f32(0.0)
    if predicted_noise is not None and actual_noise is not None:
        diff = jnp.mean((predicted_noise.astype(f32) - actual_noise.astype(f32)) ** 2)
    return mse + lmbd * kl + lmbd2 * diff


def custom_loss(inputs, targets, mu, logvar, lmbd, lmbd2,
                actual_noise=None, predicted_noise=None, use_pallas=None):
    """JAX/Pallas equivalent of CustomLoss.forward (PyTorch semantics)."""
    has_noise = predicted_noise is not None and actual_noise is not None
    if use_pallas is None:
        streamed = inputs.size * _itemsize(inputs) + targets.size * _itemsize(targets)
        if has_noise:
            streamed += (predicted_noise.size * _itemsize(predicted_noise)
                         + actual_noise.size * _itemsize(actual_noise))
        use_pallas = streamed >= _PALLAS_MIN_BYTES
    if not use_pallas:
        return _jax_loss(inputs, targets, mu, logvar, lmbd, lmbd2,
                         actual_noise=actual_noise, predicted_noise=predicted_noise)

    mse_sum, kl_sum, diff_sum = _pallas_loss_sums(
        inputs, targets, mu, logvar,
        predicted_noise=predicted_noise, actual_noise=actual_noise)

    mse_loss = mse_sum / inputs.size
    kl_loss = -0.5 * (kl_sum / mu.size)
    diffusion_loss = (diff_sum / predicted_noise.size) if has_noise \
        else jnp.float32(0.0)
    return mse_loss + lmbd * kl_loss + lmbd2 * diffusion_loss


# ---------------------------------------------------------------------------
# Demo / correctness check
# ---------------------------------------------------------------------------
if __name__ == "__main__":
    key = jax.random.PRNGKey(0)
    ks = jax.random.split(key, 12)
    lmbd, lmbd2 = 0.1, 0.5

    # ---- small case (module-consistent shapes), Pallas path forced ----------
    inputs = jax.random.normal(ks[0], (2, 4, 16, 16), jnp.float32)
    targets = jax.random.normal(ks[1], (2, 4, 16, 16), jnp.float32)
    mu = jax.random.normal(ks[2], (2, 32), jnp.float32)
    logvar = jax.random.normal(ks[3], (2, 32), jnp.float32)
    actual_noise = jax.random.normal(ks[4], (2, 4, 16, 16), jnp.float32)
    predicted_noise = jax.random.normal(ks[5], (2, 4, 16, 16), jnp.float32)

    loss = custom_loss(inputs, targets, mu, logvar, lmbd, lmbd2,
                       actual_noise=actual_noise,
                       predicted_noise=predicted_noise, use_pallas=True)
    loss = jax.block_until_ready(loss)
    ref = jax.block_until_ready(
        _jax_loss(inputs, targets, mu, logvar, lmbd, lmbd2,
                  actual_noise=actual_noise, predicted_noise=predicted_noise))
    assert jnp.allclose(loss, ref, rtol=1e-5, atol=1e-5), (loss, ref)

    # ---- same inputs without the diffusion term (other kernel variant) ------
    loss_nn = custom_loss(inputs, targets, mu, logvar, lmbd, lmbd2, use_pallas=True)
    loss_nn = jax.block_until_ready(loss_nn)
    ref_nn = jax.block_until_ready(_jax_loss(inputs, targets, mu, logvar, lmbd, lmbd2))
    assert jnp.allclose(loss_nn, ref_nn, rtol=1e-5, atol=1e-5), (loss_nn, ref_nn)

    # ---- medium case: multi-block streaming, JAX tail, differing-size ragged
    #      noise stream (exercises per-stream guards and the pad fallback) ----
    shp = (17, 4, 256, 128)                  # 2,228,224 elems -> 17408 rows
    nshp = (4, 1000, 33)                     # 132,000 elems (not a multiple of 128)
    inputs_m = jax.random.normal(ks[6], shp, jnp.float32)
    targets_m = jax.random.normal(ks[7], shp, jnp.float32)
    mu_m = jax.random.normal(ks[8], (4, 64), jnp.float32)
    logvar_m = jax.random.normal(ks[9], (4, 64), jnp.float32)
    actual_m = jax.random.normal(ks[10], nshp, jnp.float32)
    pred_m = jax.random.normal(ks[11], nshp, jnp.float32)

    loss_m = custom_loss(inputs_m, targets_m, mu_m, logvar_m, lmbd, lmbd2,
                         actual_noise=actual_m, predicted_noise=pred_m,
                         use_pallas=True)
    loss_m = jax.block_until_ready(loss_m)
    ref_m = jax.block_until_ready(
        _jax_loss(inputs_m, targets_m, mu_m, logvar_m, lmbd, lmbd2,
                  actual_noise=actual_m, predicted_noise=pred_m))
    assert jnp.allclose(loss_m, ref_m, rtol=1e-4, atol=1e-4), (loss_m, ref_m)

    print("KERNEL_OK")
</pallas_src>

<mosaic_0001>
module attributes {stable_mosaic.version = 11 : i64} {
  func.func @kernel(%arg0: i32, %arg1: i32, %arg2: memref<16x128xf32, #tpu.memory_space<vmem>>, %arg3: memref<16x128xf32, #tpu.memory_space<vmem>>, %arg4: memref<16x128xf32, #tpu.memory_space<vmem>>, %arg5: memref<16x128xf32, #tpu.memory_space<vmem>>, %arg6: memref<8x128xf32, #tpu.memory_space<vmem>>, %arg7: memref<8x128xf32, #tpu.memory_space<vmem>>, %arg8: memref<8x128xf32, #tpu.memory_space<vmem>>, %arg9: memref<8x128xf32, #tpu.memory_space<vmem>>, %arg10: memref<8x128xf32, #tpu.memory_space<vmem>>) attributes {dimension_semantics = [#tpu.dimension_semantics<parallel>, #tpu.dimension_semantics<arbitrary>], iteration_bounds = array<i64: 1, 1>, scalar_prefetch = 0 : i64, scratch_operands = 0 : i64, tpu.core_type = #tpu.core_type<tc>, window_params = [{transform_indices = @transform_0, window_bounds = array<i64: 16, 128>}, {transform_indices = @transform_1, window_bounds = array<i64: 16, 128>}, {transform_indices = @transform_2, window_bounds = array<i64: 16, 128>}, {transform_indices = @transform_3, window_bounds = array<i64: 16, 128>}, {pipeline_mode = #tpu.pipeline_mode<synchronous>, transform_indices = @transform_4, window_bounds = array<i64: 8, 128>}, {pipeline_mode = #tpu.pipeline_mode<synchronous>, transform_indices = @transform_5, window_bounds = array<i64: 8, 128>}, {transform_indices = @transform_6, window_bounds = array<i64: 8, 128>}, {transform_indices = @transform_7, window_bounds = array<i64: 8, 128>}, {transform_indices = @transform_8, window_bounds = array<i64: 8, 128>}]} {
    %c1_i32 = arith.constant 1 : i32
    %0 = arith.muli %arg0, %c1_i32 : i32
    %1 = arith.addi %0, %arg1 : i32
    %c0_i32 = arith.constant 0 : i32
    %2 = arith.cmpi eq, %arg1, %c0_i32 : i32
    %3 = arith.extui %2 : i1 to i32
    %c0_i32_0 = arith.constant 0 : i32
    %4 = arith.cmpi ne, %3, %c0_i32_0 : i32
    scf.if %4 {
      %cst = arith.constant 0.000000e+00 : f32
      %14 = vector.broadcast %cst : f32 to vector<8x128xf32>
      %c0 = arith.constant 0 : index
      %c0_7 = arith.constant 0 : index
      %15 = vector.load %arg8[%c0, %c0_7] : memref<8x128xf32, #tpu.memory_space<vmem>>, vector<8x128xf32>
      tpu.vector_store %arg8[%c0, %c0_7], %14 {strides = array<i32>} : memref<8x128xf32, #tpu.memory_space<vmem>>, vector<8x128xf32>,
      %cst_8 = arith.constant 0.000000e+00 : f32
      %16 = vector.broadcast %cst_8 : f32 to vector<8x128xf32>
      %c0_9 = arith.constant 0 : index
      %c0_10 = arith.constant 0 : index
      %17 = vector.load %arg9[%c0_9, %c0_10] : memref<8x128xf32, #tpu.memory_space<vmem>>, vector<8x128xf32>
      tpu.vector_store %arg9[%c0_9, %c0_10], %16 {strides = array<i32>} : memref<8x128xf32, #tpu.memory_space<vmem>>, vector<8x128xf32>,
    } else {
    }
    %c1_i32_1 = arith.constant 1 : i32
    %5 = arith.cmpi slt, %1, %c1_i32_1 : i32
    %6 = arith.extui %5 : i1 to i32
    %c0_i32_2 = arith.constant 0 : i32
    %7 = arith.cmpi ne, %6, %c0_i32_2 : i32
    scf.if %7 {
      %c0 = arith.constant 0 : index
      %c0_7 = arith.constant 0 : index
      %14 = vector.load %arg2[%c0, %c0_7] : memref<16x128xf32, #tpu.memory_space<vmem>>, vector<16x128xf32>
      %c0_8 = arith.constant 0 : index
      %c0_9 = arith.constant 0 : index
      %15 = vector.load %arg3[%c0_8, %c0_9] : memref<16x128xf32, #tpu.memory_space<vmem>>, vector<16x128xf32>
      %16 = arith.subf %14, %15 : vector<16x128xf32>
      %c0_10 = arith.constant 0 : index
      %c0_11 = arith.constant 0 : index
      %17 = vector.load %arg8[%c0_10, %c0_11] : memref<8x128xf32, #tpu.memory_space<vmem>>, vector<8x128xf32>
      %18 = arith.mulf %16, %16 : vector<16x128xf32>
      %19 = vector.shape_cast %18 : vector<16x128xf32> to vector<2x8x128xf32>
      %cst = arith.constant dense<0.000000e+00> : vector<8x128xf32>
      %20 = vector.multi_reduction <add>, %19, %cst [0] : vector<2x8x128xf32> to vector<8x128xf32>
      %21 = arith.addf %17, %20 : vector<8x128xf32>
      %c0_12 = arith.constant 0 : index
      %c0_13 = arith.constant 0 : index
      %22 = vector.load %arg8[%c0_12, %c0_13] : memref<8x128xf32, #tpu.memory_space<vmem>>, vector<8x128xf32>
      tpu.vector_store %arg8[%c0_12, %c0_13], %21 {strides = array<i32>} : memref<8x128xf32, #tpu.memory_space<vmem>>, vector<8x128xf32>,
    } else {
    }
    %c1_i32_3 = arith.constant 1 : i32
    %8 = arith.cmpi slt, %1, %c1_i32_3 : i32
    %9 = arith.extui %8 : i1 to i32
    %c0_i32_4 = arith.constant 0 : i32
    %10 = arith.cmpi ne, %9, %c0_i32_4 : i32
    scf.if %10 {
      %c0 = arith.constant 0 : index
      %c0_7 = arith.constant 0 : index
      %14 = vector.load %arg4[%c0, %c0_7] : memref<16x128xf32, #tpu.memory_space<vmem>>, vector<16x128xf32>
      %c0_8 = arith.constant 0 : index
      %c0_9 = arith.constant 0 : index
      %15 = vector.load %arg5[%c0_8, %c0_9] : memref<16x128xf32, #tpu.memory_space<vmem>>, vector<16x128xf32>
      %16 = arith.subf %14, %15 : vector<16x128xf32>
      %c0_10 = arith.constant 0 : index
      %c0_11 = arith.constant 0 : index
      %17 = vector.load %arg9[%c0_10, %c0_11] : memref<8x128xf32, #tpu.memory_space<vmem>>, vector<8x128xf32>
      %18 = arith.mulf %16, %16 : vector<16x128xf32>
      %19 = vector.shape_cast %18 : vector<16x128xf32> to vector<2x8x128xf32>
      %cst = arith.constant dense<0.000000e+00> : vector<8x128xf32>
      %20 = vector.multi_reduction <add>, %19, %cst [0] : vector<2x8x128xf32> to vector<8x128xf32>
      %21 = arith.addf %17, %20 : vector<8x128xf32>
      %c0_12 = arith.constant 0 : index
      %c0_13 = arith.constant 0 : index
      %22 = vector.load %arg9[%c0_12, %c0_13] : memref<8x128xf32, #tpu.memory_space<vmem>>, vector<8x128xf32>
      tpu.vector_store %arg9[%c0_12, %c0_13], %21 {strides = array<i32>} : memref<8x128xf32, #tpu.memory_space<vmem>>, vector<8x128xf32>,
    } else {
    }
    %c0_i32_5 = arith.constant 0 : i32
    %11 = arith.cmpi eq, %arg1, %c0_i32_5 : i32
    %12 = arith.extui %11 : i1 to i32
    %c0_i32_6 = arith.constant 0 : i32
    %13 = arith.cmpi ne, %12, %c0_i32_6 : i32
    scf.if %13 {
      %c0 = arith.constant 0 : index
      %c0_7 = arith.constant 0 : index
      %14 = vector.load %arg7[%c0, %c0_7] : memref<8x128xf32, #tpu.memory_space<vmem>>, vector<8x128xf32>
      %cst = arith.constant -1.000000e+01 : f32
      %cst_8 = arith.constant 1.000000e+01 : f32
      %15 = vector.broadcast %cst : f32 to vector<8x128xf32>
      %16 = arith.maximumf %15, %14 : vector<8x128xf32>
      %17 = vector.broadcast %cst_8 : f32 to vector<8x128xf32>
      %18 = arith.minimumf %17, %16 : vector<8x128xf32>
      %c0_9 = arith.constant 0 : index
      %c0_10 = arith.constant 0 : index
      %19 = vector.load %arg6[%c0_9, %c0_10] : memref<8x128xf32, #tpu.memory_space<vmem>>, vector<8x128xf32>
      %cst_11 = arith.constant 1.000000e+00 : f32
      %20 = vector.broadcast %cst_11 : f32 to vector<8x128xf32>
      %21 = arith.addf %20, %18 : vector<8x128xf32>
      %22 = arith.mulf %19, %19 : vector<8x128xf32>
      %23 = arith.subf %21, %22 : vector<8x128xf32>
      %24 = math.exp %18 : vector<8x128xf32>
      %25 = arith.subf %23, %24 : vector<8x128xf32>
      %c0_i32_12 = arith.constant 0 : i32
      %26 = arith.cmpi eq, %arg0, %c0_i32_12 : i32
      %cst_13 = arith.constant 0.000000e+00 : f32
      %27 = vector.broadcast %cst_13 : f32 to vector<8x128xf32>
      %28 = arith.select %26, %25, %27 : vector<8x128xf32>
      %c0_14 = arith.constant 0 : index
      %c0_15 = arith.constant 0 : index
      %29 = vector.load %arg10[%c0_14, %c0_15] : memref<8x128xf32, #tpu.memory_space<vmem>>, vector<8x128xf32>
      tpu.vector_store %arg10[%c0_14, %c0_15], %28 {strides = array<i32>} : memref<8x128xf32, #tpu.memory_space<vmem>>, vector<8x128xf32>,
    } else {
    }
    return
  }
  func.func @transform_0(%arg0: i32, %arg1: i32) -> (i32, i32) {
    %c1_i32 = arith.constant 1 : i32
    %0 = arith.muli %arg0, %c1_i32 : i32
    %1 = arith.addi %0, %arg1 : i32
    %c0_i32 = arith.constant 0 : i32
    %2 = arith.minsi %1, %c0_i32 : i32
    %c0_i32_0 = arith.constant 0 : i32
    %c0_i32_1 = arith.constant 0 : i32
    return %2, %c0_i32_0 : i32, i32
  }
  func.func @transform_1(%arg0: i32, %arg1: i32) -> (i32, i32) {
    %c1_i32 = arith.constant 1 : i32
    %0 = arith.muli %arg0, %c1_i32 : i32
    %1 = arith.addi %0, %arg1 : i32
    %c0_i32 = arith.constant 0 : i32
    %2 = arith.minsi %1, %c0_i32 : i32
    %c0_i32_0 = arith.constant 0 : i32
    %c0_i32_1 = arith.constant 0 : i32
    return %2, %c0_i32_0 : i32, i32
  }
  func.func @transform_2(%arg0: i32, %arg1: i32) -> (i32, i32) {
    %c1_i32 = arith.constant 1 : i32
    %0 = arith.muli %arg0, %c1_i32 : i32
    %1 = arith.addi %0, %arg1 : i32
    %c0_i32 = arith.constant 0 : i32
    %2 = arith.minsi %1, %c0_i32 : i32
    %c0_i32_0 = arith.constant 0 : i32
    %c0_i32_1 = arith.constant 0 : i32
    return %2, %c0_i32_0 : i32, i32
  }
  func.func @transform_3(%arg0: i32, %arg1: i32) -> (i32, i32) {
    %c1_i32 = arith.constant 1 : i32
    %0 = arith.muli %arg0, %c1_i32 : i32
    %1 = arith.addi %0, %arg1 : i32
    %c0_i32 = arith.constant 0 : i32
    %2 = arith.minsi %1, %c0_i32 : i32
    %c0_i32_0 = arith.constant 0 : i32
    %c0_i32_1 = arith.constant 0 : i32
    return %2, %c0_i32_0 : i32, i32
  }
  func.func @transform_4(%arg0: i32, %arg1: i32) -> (i32, i32) {
    %c0_i32 = arith.constant 0 : i32
    %c0_i32_0 = arith.constant 0 : i32
    %c0_i32_1 = arith.constant 0 : i32
    return %c0_i32, %c0_i32_0 : i32, i32
  }
  func.func @transform_5(%arg0: i32, %arg1: i32) -> (i32, i32) {
    %c0_i32 = arith.constant 0 : i32
    %c0_i32_0 = arith.constant 0 : i32
    %c0_i32_1 = arith.constant 0 : i32
    return %c0_i32, %c0_i32_0 : i32, i32
  }
  func.func @transform_6(%arg0: i32, %arg1: i32) -> (i32, i32) {
    %c0_i32 = arith.constant 0 : i32
    %c0_i32_0 = arith.constant 0 : i32
    return %arg0, %c0_i32 : i32, i32
  }
  func.func @transform_7(%arg0: i32, %arg1: i32) -> (i32, i32) {
    %c0_i32 = arith.constant 0 : i32
    %c0_i32_0 = arith.constant 0 : i32
    return %arg0, %c0_i32 : i32, i32
  }
  func.func @transform_8(%arg0: i32, %arg1: i32) -> (i32, i32) {
    %c0_i32 = arith.constant 0 : i32
    %c0_i32_0 = arith.constant 0 : i32
    return %arg0, %c0_i32 : i32, i32
  }
}

</mosaic_0001>

<bundles_post_ra>
// kernel: tpu_custom_call.1
= control target key start
LH: loop header
LB: loop body
LE: loop exit
PB: predicated region body
PF: predicated region fallthrough
CT: control target
= control target key end

     0   :  { %14 = vsyncpa [#allocation3], 0  ;;  %s583_s0 = inlined_call_operand.hbm [shape: f32[16,128], index: 0, kind: input, shape index: {}]   ;;  %s584_s1 = inlined_call_operand.hbm [shape: f32[16,128], index: 1, kind: input, shape index: {}]   ;;  %s585_s2 = inlined_call_operand.hbm [shape: f32[16,128], index: 2, kind: input, shape index: {}]   ;;  %s586_s3 = inlined_call_operand.hbm [shape: f32[16,128], index: 3, kind: input, shape index: {}]   ;;  %s587_s4 = inlined_call_operand.vmem [shape: f32[8,128], index: 4, kind: input, shape index: {}]   ;;  %s588_s5 = inlined_call_operand.vmem [shape: f32[8,128], index: 5, kind: input, shape index: {}]   ;;  %s589_s6 = inlined_call_operand.hbm [shape: f32[8,128], index: 6, kind: output, shape index: {0}]   ;;  %s590_s7 = inlined_call_operand.hbm [shape: f32[8,128], index: 7, kind: output, shape index: {1}]   ;;  %s591_s8 = inlined_call_operand.hbm [shape: f32[8,128], index: 8, kind: output, shape index: {2}]  }
   0x1   :  { %15 = vsyncpa [#allocation6], 0 }
   0x2   :  { %16 = vsyncpa [#allocation9], 0 }
   0x3   :  { %17 = vsyncpa [#allocation4], 0 }
   0x4   :  { %18 = vsyncpa [#allocation12], 0  ;;  %s406_s27 = smov [#allocation5]   ;;  %s407_s29 = smov [#allocation2]  }
   0x5   :  { %s48_s28 = sshll.u32 %s406_s27, 4  ;;  %s30_s30 = sshll.u32 %s407_s29, 4  ;;  %s49_s28 = int_to_ptr.vmem [resolvable:$true] %s48_s28  ;;  %s460_s30 = int_to_ptr.vmem [resolvable:$true] %s30_s30 }
   0x6   :  { %s242_s11 = scalar_lea.hbm %s584_s1, 256 }
   0x7   :  { %p243_p0 = scmp.ne.s32.totalorder %s584_s1, %s242_s11  ;;  %p246_p1 = scmp.lt.u32.totalorder %s242_s11, %s584_s1 }
   0x9   :  { %p248_p2 = pnand %p246_p1, %p243_p0 }
   0xb   :  { %251 = shalt.err (!%p248_p2)
}
   0xc   :  { %s252_s16 = scalar_lea.vmem %s49_s28, 256  ;;  %p257_p4 = scmp.lt.s32.totalorder %s49_s28, %s49_s28 }
   0xd   :  { %p253_p3 = scmp.ne.s32.totalorder %s49_s28, %s252_s16  ;;  %p258_p5 = scmp.lt.s32.totalorder %s252_s16, %s252_s16 }
   0xf   :  { %p259_p6 = por %p258_p5, %p257_p4 }
  0x11   :  { %p260_p7 = pnand %p259_p6, %p253_p3 }
  0x13   :  { %263 = shalt.err (!%p260_p7)
}
  0x14   :  { %s408_s17 = smov 128   ;;  %s409_s18 = smov 8  }
  0x15   :  { %54 = dma.hbm_to_vmem [thread:$0]  %s584_s1, 256, %s49_s28, [#allocation6], %s408_s17, %s408_s17, %s409_s18  }
  0x16   :  { %s264_s23 = scalar_lea.hbm %s583_s0, 256 }
  0x17   :  { %p265_p8 = scmp.ne.s32.totalorder %s583_s0, %s264_s23  ;;  %p268_p9 = scmp.lt.u32.totalorder %s264_s23, %s583_s0 }
  0x19   :  { %p270_p10 = pnand %p268_p9, %p265_p8 }
  0x1b   :  { %273 = shalt.err (!%p270_p10)
}
  0x1c   :  { %s274_s29 = scalar_lea.vmem %s460_s30, 256  ;;  %p279_p12 = scmp.lt.s32.totalorder %s460_s30, %s460_s30 }
  0x1d   :  { %p275_p11 = scmp.ne.s32.totalorder %s460_s30, %s274_s29  ;;  %p280_p13 = scmp.lt.s32.totalorder %s274_s29, %s274_s29 }
  0x1f   :  { %p281_p0 = por %p280_p13, %p279_p12 }
  0x21   :  { %p282_p1 = pnand %p281_p0, %p275_p11 }
  0x23   :  { %285 = shalt.err (!%p282_p1)
}
  0x24   :  { %36 = dma.hbm_to_vmem [thread:$0]  %s583_s0, 256, %s460_s30, [#allocation3], %s408_s17, %s408_s17, %s409_s18  }
  0x25   :  { %s410_s9 = smov [#allocation7]   ;;  %s411_s11 = smov [#allocation8]  }
  0x26   :  { %s66_s10 = sshll.u32 %s410_s9, 4  ;;  %s84_s12 = sshll.u32 %s411_s11, 4  ;;  %s67_s10 = int_to_ptr.vmem [resolvable:$true] %s66_s10  ;;  %s497_s12 = int_to_ptr.vmem [resolvable:$true] %s84_s12 }
  0x27   :  { %s286_s15 = scalar_lea.hbm %s585_s2, 256 }
  0x28   :  { %p287_p2 = scmp.ne.s32.totalorder %s585_s2, %s286_s15  ;;  %p290_p3 = scmp.lt.u32.totalorder %s286_s15, %s585_s2 }
  0x2a   :  { %p292_p4 = pnand %p290_p3, %p287_p2 }
  0x2c   :  { %295 = shalt.err (!%p292_p4)
}
  0x2d   :  { %s296_s0 = scalar_lea.vmem %s67_s10, 256  ;;  %p301_p6 = scmp.lt.s32.totalorder %s67_s10, %s67_s10 }
  0x2e   :  { %p297_p5 = scmp.ne.s32.totalorder %s67_s10, %s296_s0  ;;  %p302_p7 = scmp.lt.s32.totalorder %s296_s0, %s296_s0 }
  0x30   :  { %p303_p8 = por %p302_p7, %p301_p6 }
  0x32   :  { %p304_p9 = pnand %p303_p8, %p297_p5 }
  0x34   :  { %307 = shalt.err (!%p304_p9)
}
  0x35   :  { %72 = dma.hbm_to_vmem [thread:$0]  %s585_s2, 256, %s67_s10, [#allocation6], %s408_s17, %s408_s17, %s409_s18  }
  0x36   :  { %s308_s25 = scalar_lea.hbm %s586_s3, 256 }
  0x37   :  { %p309_p10 = scmp.ne.s32.totalorder %s586_s3, %s308_s25  ;;  %p312_p11 = scmp.lt.u32.totalorder %s308_s25, %s586_s3 }
  0x39   :  { %p314_p12 = pnand %p312_p11, %p309_p10 }
  0x3b   :  { %317 = shalt.err (!%p314_p12)
}
  0x3c   :  { %s318_s28 = scalar_lea.vmem %s497_s12, 256  ;;  %p323_p0 = scmp.lt.s32.totalorder %s497_s12, %s497_s12 }
  0x3d   :  { %p319_p13 = scmp.ne.s32.totalorder %s497_s12, %s318_s28  ;;  %p324_p1 = scmp.lt.s32.totalorder %s318_s28, %s318_s28 }
  0x3f   :  { %p325_p2 = por %p324_p1, %p323_p0 }
  0x41   :  { %p326_p3 = pnand %p325_p2, %p319_p13 }
  0x43   :  { %329 = shalt.err (!%p326_p3)
}
  0x44   :  { %90 = dma.hbm_to_vmem [thread:$0]  %s586_s3, 256, %s497_s12, [#allocation9], %s408_s17, %s408_s17, %s409_s18  }
  0x45   :  { %396 = dma.done.wait [#allocation3], 256  }
  0x46   :  { %397 = vsyncadd [#allocation3], 4294967040 }
  0x47   :  { %398 = dma.done.wait [#allocation6], 512  }
  0x48   :  { %399 = vsyncadd [#allocation6], 4294966784 }
  0x49   :  { %400 = dma.done.wait [#allocation9], 256  }
  0x4a   :  { %401 = vsyncadd [#allocation9], 4294967040  ;;  %v146_v0 = vld [vmem:[#allocation7] sm:$0xff]  ;;  %v147_v1 = vld [vmem:[#allocation7 + $0x8] sm:$0xff]  ;;  %s412_s3 = smov [#allocation11]   ;;  %s413_s18 = smov [#allocation10]  }
  0x4b   :  { %v148_v2 = vld [vmem:[#allocation8] sm:$0xff]  ;;  %v149_v3 = vld [vmem:[#allocation8 + $0x8] sm:$0xff]  ;;  %v134_v5 = vld [vmem:[#allocation2] sm:$0xff]  ;;  %s193_s17 = sshll.u32 %s412_s3, 4  ;;  %s183_s12 = sshll.u32 %s413_s18, 4  ;;  %s194_s17 = int_to_ptr.vmem [resolvable:$true] %s193_s17  ;;  %s540_s12 = int_to_ptr.vmem [resolvable:$true] %s183_s12 }
  0x4c   :  { %v150_v4 = vsub.f32 %v146_v0, %v148_v2  ;;  %v135_v6 = vld [vmem:[#allocation2 + $0x8] sm:$0xff]  ;;  %v151_v7 = vsub.f32 %v147_v1, %v149_v3  ;;  %v136_v8 = vld [vmem:[#allocation5] sm:$0xff]  ;;  %v137_v9 = vld [vmem:[#allocation5 + $0x8] sm:$0xff]  ;;  %p335_p5 = scmp.lt.s32.totalorder %s194_s17, %s194_s17 }
  0x4d   :  { %v161_v10 = vld [vmem:[%s588_s5] sm:$0xff]  ;;  %v138_v12 = vsub.f32 %v134_v5, %v136_v8  ;;  %v139_v13 = vsub.f32 %v135_v6, %v137_v9  ;;  %s330_s5 = scalar_lea.vmem %s194_s17, 128 }
  0x4e   :  { %v153_v11 = vmul.f32 %v150_v4, %v150_v4  ;;  %v229_v14 = vclamps-f32 %v161_v10, 10.0  ;;  %v154_v15 = vmul.f32 %v151_v7, %v151_v7  ;;  %v164_v21 = vld [vmem:[%s587_s4] sm:$0xff]  ;;  %p331_p4 = scmp.ne.s32.totalorder %s194_s17, %s330_s5  ;;  %p336_p6 = scmp.lt.s32.totalorder %s330_s5, %s330_s5 }
  0x4f   :  { %v141_v16 = vmul.f32 %v138_v12, %v138_v12  ;;  %v142_v17 = vmul.f32 %v139_v13, %v139_v13  ;;  %v166_v23 = vmul.f32 %v164_v21, %v164_v21 }
  0x50   :  { %v168_v18 = vmul.f32 1.442695, %v229_v14  ;;  %v155_v19 = vadd.f32 %v154_v15, %v153_v11  ;;  %v165_v22 = vadd.f32 1.0, %v229_v14  ;;  %p337_p7 = por %p336_p6, %p335_p5 }
  0x51   :  { %v143_v20 = vadd.f32 %v142_v17, %v141_v16 }
  0x52   :  { %240 = vpow2.f32 %v168_v18  ;;  %157 = vst [vmem:[#allocation11] sm:$0xff] %v155_v19  ;;  %p338_p8 = pnand %p337_p7, %p331_p4 }
  0x53   :  { %145 = vst [vmem:[#allocation10] sm:$0xff] %v143_v20 }
  0x54   :  { %341 = shalt.err (!%p338_p8)
}
  0x55   :  { %s342_s19 = scalar_lea.hbm %s590_s7, 128 }
  0x56   :  { %p343_p9 = scmp.ne.s32.totalorder %s590_s7, %s342_s19  ;;  %p346_p10 = scmp.lt.u32.totalorder %s342_s19, %s590_s7 }
  0x58   :  { %p348_p11 = pnand %p346_p10, %p343_p9 }
  0x5a   :  { %351 = shalt.err (!%p348_p11)
}
  0x5b   :  { %196 = dma.vmem_to_hbm [thread:$0]  %s194_s17, 128, %s590_s7, [#allocation12]  }
  0x5c   :  { %s352_s23 = scalar_lea.vmem %s540_s12, 128  ;;  %p357_p13 = scmp.lt.s32.totalorder %s540_s12, %s540_s12 }
  0x5d   :  { %p353_p12 = scmp.ne.s32.totalorder %s540_s12, %s352_s23  ;;  %p358_p0 = scmp.lt.s32.totalorder %s352_s23, %s352_s23 }
  0x5f   :  { %p359_p1 = por %p358_p0, %p357_p13 }
  0x61   :  { %p360_p2 = pnand %p359_p1, %p353_p12 }
  0x63   :  { %363 = shalt.err (!%p360_p2)
}
  0x64   :  { %s364_s26 = scalar_lea.hbm %s589_s6, 128 }
  0x65   :  { %p365_p3 = scmp.ne.s32.totalorder %s589_s6, %s364_s26  ;;  %p368_p4 = scmp.lt.u32.totalorder %s364_s26, %s589_s6 }
  0x67   :  { %p370_p5 = pnand %p368_p4, %p365_p3 }
  0x69   :  { %373 = shalt.err (!%p370_p5)
}
  0x6a   :  { %186 = dma.vmem_to_hbm [thread:$0]  %s540_s12, 128, %s589_s6, [#allocation4]   ;;  %v167_v24 = vsub.f32 %v165_v22, %v166_v23  ;;  %v241_v25 = vpop.eup %240 }
  0x6b   :  { %s414_s9 = smov [#allocation13]  }
  0x6c   :  { %s203_s10 = sshll.u32 %s414_s9, 4  ;;  %v170_v26 = vsub.f32 %v167_v24, %v241_v25  ;;  %s204_s10 = int_to_ptr.vmem [resolvable:$true] %s203_s10 }
  0x6d   :  { %s374_s11 = scalar_lea.vmem %s204_s10, 128  ;;  %p379_p7 = scmp.lt.s32.totalorder %s204_s10, %s204_s10 }
  0x6e   :  { %176 = vst [vmem:[#allocation13] sm:$0xff] %v170_v26  ;;  %p375_p6 = scmp.ne.s32.totalorder %s204_s10, %s374_s11  ;;  %p380_p8 = scmp.lt.s32.totalorder %s374_s11, %s374_s11 }
  0x70   :  { %p381_p9 = por %p380_p8, %p379_p7 }
  0x72   :  { %p382_p10 = pnand %p381_p9, %p375_p6 }
  0x74   :  { %385 = shalt.err (!%p382_p10)
}
  0x75   :  { %s386_s18 = scalar_lea.hbm %s591_s8, 128 }
  0x76   :  { %p387_p11 = scmp.ne.s32.totalorder %s591_s8, %s386_s18  ;;  %p390_p12 = scmp.lt.u32.totalorder %s386_s18, %s591_s8 }
  0x78   :  { %p392_p13 = pnand %p390_p12, %p387_p11 }
  0x7a   :  { %395 = shalt.err (!%p392_p13)
}
  0x7b   :  { %206 = dma.vmem_to_hbm [thread:$0]  %s204_s10, 128, %s591_s8, [#allocation12]  }
  0x7c   :  { %402 = dma.done.wait [#allocation4], 128  }
  0x7d   :  { %403 = vsyncadd [#allocation4], 4294967168 }
  0x7e   :  { %404 = dma.done.wait [#allocation12], 256  }
  0x7f   :  { %405 = vsyncadd [#allocation12], 4294967040 }
  0x80   :  { %216 = vsyncpa [#allocation3], 1 }
  0x81   :  { %217 = vsyncpa [#allocation6], 1 }
  0x82   :  { %218 = vsyncpa [#allocation9], 1 }
  0x83   :  { %219 = vsyncpa [#allocation4], 1 }
  0x84   :  { %220 = vsyncpa [#allocation12], 1 }

</bundles_post_ra>
